<compile_context>
chip_gen: v6e
topology: v6e:2x2x1
jax: 0.10.0
libtpu: 0.0.40
codegen_flags: <defaults>
</compile_context>

<pallas_src>
import jax
import jax.numpy as jnp
from jax.experimental import pallas as pl
from jax.experimental.pallas import tpu as pltpu


def _round_up(x: int, m: int) -> int:
    return ((x + m - 1) // m) * m


def _nn_embedding_kernel(x_ref, w_ref, b_ref, o_ref):
    # x_ref: (TM, F_in), w_ref: (F_in, F_out_pad), b_ref: (1, F_out_pad) f32,
    # o_ref: (TM, F_out_pad)
    x = x_ref[...]
    w = w_ref[...]
    b = b_ref[...]
    # MXU matmul with f32 accumulation; bias + ReLU epilogue in f32; cast at store.
    acc = jnp.dot(x, w, preferred_element_type=jnp.float32)
    y = jnp.maximum(acc + b, 0.0)
    o_ref[...] = y.astype(o_ref.dtype)


def nn_embedding(x, w_t, b, *, tile_m=None, compute_dtype=None, out_dtype=None):
    """relu(x @ w_t + b) via Pallas.

    x:   (N, F_in)
    w_t: (F_in, F_out)  (transposed torch Linear weight)
    b:   (F_out,)
    compute_dtype: dtype for the matmul operands (e.g. jnp.bfloat16 on v6e/v7x).
    out_dtype:     dtype of the returned array (default: x.dtype).
    """
    N, F_in = x.shape
    F_in_w, F_out = w_t.shape
    assert F_in_w == F_in
    out_dtype = out_dtype if out_dtype is not None else x.dtype
    compute_dtype = compute_dtype if compute_dtype is not None else x.dtype

    # Lane-dense output: pad F_out to a multiple of 128 lanes.
    F_out_pad = _round_up(F_out, 128)

    # Bounded, sublane-aligned row tile (multiple of 16 covers f32 and bf16 tiling).
    if tile_m is None:
        tile_m = min(512, _round_up(N, 16))
    tile_m = _round_up(tile_m, 16)
    N_pad = _round_up(N, tile_m)
    assert tile_m % 8 == 0 and N_pad % tile_m == 0

    # Operand casts (bf16 halves DMA bytes; accumulation stays f32 in-kernel).
    x_c = x.astype(compute_dtype)
    w_c = w_t.astype(compute_dtype)

    # Zero-pad to the tiled shapes. Padded rows/cols are sliced off afterwards.
    if N_pad != N:
        x_c = jnp.pad(x_c, ((0, N_pad - N), (0, 0)))
    if F_out_pad != F_out:
        w_c = jnp.pad(w_c, ((0, 0), (0, F_out_pad - F_out)))
        b_p = jnp.pad(b.astype(jnp.float32), (0, F_out_pad - F_out))
    else:
        b_p = b.astype(jnp.float32)
    b2d = b_p.reshape(1, F_out_pad)

    grid = (N_pad // tile_m,)

    # Explicit VMEM budget: double-buffered x/out tiles + resident w/b, 2x headroom.
    bpe_in = jnp.dtype(compute_dtype).itemsize
    bpe_out = jnp.dtype(out_dtype).itemsize
    vmem_needed = (2 * tile_m * F_in * bpe_in          # x, double buffered
                   + 2 * tile_m * F_out_pad * bpe_out  # out, double buffered
                   + 2 * F_in * F_out_pad * bpe_in     # weight
                   + 2 * F_out_pad * 4)                # bias (f32)
    vmem_limit = int(min(48 << 20, max(16 << 20, 2 * vmem_needed)))

    out_padded = pl.pallas_call(
        _nn_embedding_kernel,
        out_shape=jax.ShapeDtypeStruct((N_pad, F_out_pad), out_dtype),
        grid_spec=pltpu.PrefetchScalarGridSpec(
            num_scalar_prefetch=0,
            grid=grid,
            in_specs=[
                pl.BlockSpec((tile_m, F_in), lambda i: (i, 0)),
                pl.BlockSpec((F_in, F_out_pad), lambda i: (0, 0)),
                pl.BlockSpec((1, F_out_pad), lambda i: (0, 0)),
            ],
            out_specs=pl.BlockSpec((tile_m, F_out_pad), lambda i: (i, 0)),
        ),
        compiler_params=pltpu.CompilerParams(
            dimension_semantics=("parallel",),
            vmem_limit_bytes=vmem_limit,
        ),
    )(x_c, w_c, b2d)

    return out_padded[:N, :F_out]


if __name__ == "__main__":
    # Module config: NNEmbedding(nb_features_in=32, nb_features_out=64)
    nb_features_in = 32
    nb_features_out = 64

    key = jax.random.PRNGKey(0)
    kx, kw, kb, kx2 = jax.random.split(key, 4)

    # Deterministic parameter init (mimics torch.nn.Linear uniform bound).
    bound = 1.0 / (nb_features_in ** 0.5)
    w = jax.random.uniform(kw, (nb_features_out, nb_features_in),
                           jnp.float32, -bound, bound)  # torch layout (out, in)
    b = jax.random.uniform(kb, (nb_features_out,), jnp.float32, -bound, bound)
    w_t = w.T  # (F_in, F_out) for the kernel

    # Case 1: tiny deployed shape (16 streamline points), f32.
    x_small = jax.random.normal(kx, (16, nb_features_in), jnp.float32)
    out_small = jax.block_until_ready(nn_embedding(x_small, w_t, b))
    ref_small = jnp.maximum(x_small @ w_t + b[None, :], 0.0)
    assert out_small.shape == (16, nb_features_out)
    assert jnp.allclose(out_small, ref_small, atol=1e-5, rtol=1e-5)

    # Case 2: larger batch, N not a multiple of the tile -> row padding + 2 grid steps.
    x_big = jax.random.normal(kx2, (1000, nb_features_in), jnp.float32)
    ref_big = jnp.maximum(x_big @ w_t + b[None, :], 0.0)

    out_big_f32 = jax.block_until_ready(nn_embedding(x_big, w_t, b))
    assert out_big_f32.shape == (1000, nb_features_out)
    assert jnp.allclose(out_big_f32, ref_big, atol=1e-4, rtol=1e-4)

    # bf16 operands (v6e/v7x fast path), f32 accumulation + epilogue, f32 output.
    out_big_bf16 = jax.block_until_ready(
        nn_embedding(x_big, w_t, b, compute_dtype=jnp.bfloat16,
                     out_dtype=jnp.float32))
    assert jnp.allclose(out_big_bf16, ref_big, atol=5e-2, rtol=5e-2)

    print("KERNEL_OK")
</pallas_src>

<mosaic_0001>
module attributes {stable_mosaic.version = 11 : i64} {
  func.func @_nn_embedding_kernel(%arg0: i32, %arg1: memref<16x32xf32, #tpu.memory_space<vmem>>, %arg2: memref<32x128xf32, #tpu.memory_space<vmem>>, %arg3: memref<1x128xf32, #tpu.memory_space<vmem>>, %arg4: memref<16x128xf32, #tpu.memory_space<vmem>>) attributes {dimension_semantics = [#tpu.dimension_semantics<parallel>], iteration_bounds = array<i64: 1>, scalar_prefetch = 0 : i64, scratch_operands = 0 : i64, tpu.core_type = #tpu.core_type<tc>, window_params = [{transform_indices = @transform_0, window_bounds = array<i64: 16, 32>}, {pipeline_mode = #tpu.pipeline_mode<synchronous>, transform_indices = @transform_1, window_bounds = array<i64: 32, 128>}, {pipeline_mode = #tpu.pipeline_mode<synchronous>, transform_indices = @transform_2, window_bounds = array<i64: 1, 128>}, {transform_indices = @transform_3, window_bounds = array<i64: 16, 128>}]} {
    %c0 = arith.constant 0 : index
    %c0_0 = arith.constant 0 : index
    %0 = vector.load %arg1[%c0, %c0_0] : memref<16x32xf32, #tpu.memory_space<vmem>>, vector<16x32xf32>
    %c0_1 = arith.constant 0 : index
    %c0_2 = arith.constant 0 : index
    %1 = vector.load %arg2[%c0_1, %c0_2] : memref<32x128xf32, #tpu.memory_space<vmem>>, vector<32x128xf32>
    %c0_3 = arith.constant 0 : index
    %c0_4 = arith.constant 0 : index
    %2 = vector.load %arg3[%c0_3, %c0_4] : memref<1x128xf32, #tpu.memory_space<vmem>>, vector<1x128xf32>
    %cst = arith.constant dense<0.000000e+00> : vector<16x128xf32>
    %3 = tpu.matmul %0, %1, %cst {dimension_numbers = #tpu.dot_dimension_numbers<[1], [0], [0], [1], [0, 0, 1, 1], [], []>} : vector<16x32xf32>, vector<32x128xf32>, vector<16x128xf32> -> vector<16x128xf32>
    %4 = vector.broadcast %2 : vector<1x128xf32> to vector<16x128xf32>
    %5 = arith.addf %3, %4 : vector<16x128xf32>
    %cst_5 = arith.constant 0.000000e+00 : f32
    %6 = vector.broadcast %cst_5 : f32 to vector<16x128xf32>
    %7 = arith.maximumf %5, %6 : vector<16x128xf32>
    %c0_6 = arith.constant 0 : index
    %c0_7 = arith.constant 0 : index
    %8 = vector.load %arg4[%c0_6, %c0_7] : memref<16x128xf32, #tpu.memory_space<vmem>>, vector<16x128xf32>
    tpu.vector_store %arg4[%c0_6, %c0_7], %7 {strides = array<i32>} : memref<16x128xf32, #tpu.memory_space<vmem>>, vector<16x128xf32>,
    return
  }
  func.func @transform_0(%arg0: i32) -> (i32, i32) {
    %c0_i32 = arith.constant 0 : i32
    %c0_i32_0 = arith.constant 0 : i32
    return %arg0, %c0_i32 : i32, i32
  }
  func.func @transform_1(%arg0: i32) -> (i32, i32) {
    %c0_i32 = arith.constant 0 : i32
    %c0_i32_0 = arith.constant 0 : i32
    %c0_i32_1 = arith.constant 0 : i32
    return %c0_i32, %c0_i32_0 : i32, i32
  }
  func.func @transform_2(%arg0: i32) -> (i32, i32) {
    %c0_i32 = arith.constant 0 : i32
    %c0_i32_0 = arith.constant 0 : i32
    %c0_i32_1 = arith.constant 0 : i32
    return %c0_i32, %c0_i32_0 : i32, i32
  }
  func.func @transform_3(%arg0: i32) -> (i32, i32) {
    %c0_i32 = arith.constant 0 : i32
    %c0_i32_0 = arith.constant 0 : i32
    return %arg0, %c0_i32 : i32, i32
  }
}

</mosaic_0001>

<bundles_post_ra>
// kernel: tpu_custom_call.1
= control target key start
LH: loop header
LB: loop body
LE: loop exit
PB: predicated region body
PF: predicated region fallthrough
CT: control target
= control target key end

     0   :  { %8 = vsyncpa [#allocation3], 0  ;;  %s299_s0 = inlined_call_operand.hbm [shape: f32[16,32], index: 0, kind: input, shape index: {}]   ;;  %s300_s1 = inlined_call_operand.hbm [shape: f32[32,128], index: 1, kind: input, shape index: {}]   ;;  %s301_s2 = inlined_call_operand.vmem [shape: f32[1,128], index: 2, kind: input, shape index: {}]   ;;  %s302_s3 = inlined_call_operand.hbm [shape: f32[16,128], index: 3, kind: output, shape index: {}]  }
   0x1   :  { %9 = vsyncpa [#allocation6], 0 }
   0x2   :  { %10 = vsyncpa [#allocation4], 0  ;;  %s251_s12 = smov [#allocation2]  }
   0x3   :  { %s16_s13 = sshll.u32 %s251_s12, 4  ;;  %s17_s13 = int_to_ptr.vmem [resolvable:$true] %s16_s13 }
   0x4   :  { %s193_s14 = scalar_lea.vmem %s17_s13, 256  ;;  %p198_p1 = scmp.lt.s32.totalorder %s17_s13, %s17_s13 }
   0x5   :  { %p194_p0 = scmp.ne.s32.totalorder %s17_s13, %s193_s14  ;;  %p199_p2 = scmp.lt.s32.totalorder %s193_s14, %s193_s14 }
   0x7   :  { %p200_p3 = por %p199_p2, %p198_p1 }
   0x9   :  { %p201_p4 = pnand %p200_p3, %p194_p0 }
   0xb   :  { %204 = shalt.err (!%p201_p4)
}
   0xc   :  { %s252_s15 = smov 128   ;;  %s253_s16 = smov 8  }
   0xd   :  { %22 = dma.hbm_to_vmem [thread:$0]  %s299_s0, 256, %s17_s13, [#allocation3], %s252_s15, %s252_s15, %s253_s16  }
   0xe   :  { %s254_s19 = smov [#allocation5]  }
   0xf   :  { %s28_s20 = sshll.u32 %s254_s19, 4  ;;  %s29_s20 = int_to_ptr.vmem [resolvable:$true] %s28_s20 }
  0x10   :  { %s213_s21 = scalar_lea.vmem %s29_s20, 512  ;;  %p218_p6 = scmp.lt.s32.totalorder %s29_s20, %s29_s20 }
  0x11   :  { %p214_p5 = scmp.ne.s32.totalorder %s29_s20, %s213_s21  ;;  %p219_p7 = scmp.lt.s32.totalorder %s213_s21, %s213_s21 }
  0x13   :  { %p220_p8 = por %p219_p7, %p218_p6 }
  0x15   :  { %p221_p9 = pnand %p220_p8, %p214_p5 }
  0x17   :  { %224 = shalt.err (!%p221_p9)
}
  0x18   :  { %34 = dma.hbm_to_vmem [thread:$0]  %s300_s1, 512, %s29_s20, [#allocation6], %s252_s15, %s252_s15, %s253_s16  }
  0x19   :  { %245 = dma.done.wait [#allocation3], 256  }
  0x1a   :  { %246 = vsyncadd [#allocation3], 4294967040 }
  0x1b   :  { %247 = dma.done.wait [#allocation6], 512  }
  0x1c   :  { %248 = vsyncadd [#allocation6], 4294966784  ;;  %vm56_vm0 = vcmask 261120   ;;  %v48_v0 = vld [vmem:[#allocation5 + $0x18] sm:$0xff]  ;;  %v47_v1 = vld [vmem:[#allocation5 + $0x10] sm:$0xff]  ;;  %s255_s24 = smov [#allocation7]  }
  0x1d   :  { %169 = vmatprep.subr.mxu0 %v48_v0  ;;  %v43_v2 = vld [vmem:[#allocation2] sm:$0xff]  ;;  %v46_v3 = vld [vmem:[#allocation5 + $0x8] sm:$0xff]  ;;  %v45_v4 = vld [vmem:[#allocation5] sm:$0xff]  ;;  %s147_s25 = sshll.u32 %s255_s24, 4  ;;  %s148_s25 = int_to_ptr.vmem [resolvable:$true] %s147_s25 }
  0x1e   :  { %170 = vmatpush3.msra.mxu0 %v48_v0  ;;  %177 = vmatprep.mubr.msk.f32.mxu0 %vm56_vm0, %v43_v2  ;;  %v44_v5 = vld [vmem:[#allocation2 + $0x8] sm:$0xff]  ;;  %v160_v6 = vld [vmem:[%s301_s2] ss:$0 sm:$0xff]  ;;  %s225_s26 = scalar_lea.vmem %s148_s25, 256  ;;  %p230_p11 = scmp.lt.s32.totalorder %s148_s25, %s148_s25 }
  0x1f   :  { %171 = vmatprep.subr.mxu0 %v47_v1  ;;  %p226_p10 = scmp.ne.s32.totalorder %s148_s25, %s225_s26  ;;  %p231_p12 = scmp.lt.s32.totalorder %s225_s26, %s225_s26 }
  0x20   :  { %172 = vmatpush3.msra.mxu0 %v47_v1 }
  0x21   :  { %173 = vmatprep.subr.mxu0 %v46_v3  ;;  %p232_p13 = por %p231_p12, %p230_p11 }
  0x22   :  { %174 = vmatpush3.msra.mxu0 %v46_v3 }
  0x23   :  { %175 = vmatprep.subr.mxu0 %v45_v4  ;;  %p233_p0 = pnand %p232_p13, %p226_p10 }
  0x24   :  { %176 = vmatpush3.msra.mxu0 %v45_v4 }
  0x25   :  { %178 = vmatmul.mubr.msk.f32.vlgmr.msra.gmra.mxu0 %vm56_vm0, %v44_v5 }
  0xe5   :  { %v179_v7 = vpop.f32.mrf.mxu0 }
  0xe6   :  { %v135_v8 = vadd.f32 %v179_v7, %v160_v6 }
  0xe7   :  { %v129_v9 = vpop.f32.mrf.mxu0 }
  0xe8   :  { %v139_v10 = vmax.f32 %v135_v8, 0.0  ;;  %v130_v11 = vadd.f32 %v160_v6, %v129_v9 }
  0xea   :  { %141 = vst [vmem:[#allocation7 + $0x8] sm:$0xff] %v139_v10  ;;  %v138_v12 = vmax.f32 %v130_v11, 0.0 }
  0xec   :  { %140 = vst [vmem:[#allocation7] sm:$0xff] %v138_v12 }
  0xed   :  { %236 = shalt.err (!%p233_p0)
}
  0xee   :  { %153 = dma.vmem_to_hbm [thread:$0]  %s148_s25, 256, %s302_s3, [#allocation4], %s252_s15, %s252_s15, %s253_s16  }
  0xef   :  { %249 = dma.done.wait [#allocation4], 256  }
  0xf0   :  { %250 = vsyncadd [#allocation4], 4294967040 }
  0xf1   :  { %157 = vsyncpa [#allocation3], 1 }
  0xf2   :  { %158 = vsyncpa [#allocation6], 1 }
  0xf3   :  { %159 = vsyncpa [#allocation4], 1 }

</bundles_post_ra>
